<compile_context>
chip_gen: v7x
topology: tpu7x:2x2x1
jax: 0.10.0
libtpu: 0.0.40
codegen_flags: <defaults>
</compile_context>

<pallas_src>
import functools

import jax
import jax.numpy as jnp
from jax.experimental import pallas as pl
from jax.experimental.pallas import tpu as pltpu

LN_EPS = 1e-5   # nn.LayerNorm default eps
BN_EPS = 1e-5   # nn.BatchNorm1d default eps

_B_ALIGN = 16   # sublane alignment chosen so bf16 batch tiles are tile-aligned


def _round_up(x, m):
    return (x + m - 1) // m * m


def _vmem_limit_bytes():
    # ~96 MiB budget on v5e/v6e (128 MiB physical, 16/32 MiB default scoped
    # limit), ~48 MiB on v7x (64 MiB physical).
    try:
        cap = pltpu.get_tpu_info().vmem_capacity_bytes
    except Exception:
        cap = 64 * 1024 * 1024
    return int(min(cap * 3 // 4, 100 * 1024 * 1024))


VMEM_LIMIT_BYTES = _vmem_limit_bytes()


def _pick_tile_b(B, C, n_mid, emb, vmem_budget):
    """Largest sublane-aligned batch tile that fits the VMEM budget."""
    b_full = _round_up(max(B, 1), _B_ALIGN)
    # Resident bf16 weights (counted double-buffered, to be safe) + small vecs.
    resident = 4 * C * n_mid + 4 * n_mid * emb + 4 * (4 * n_mid + 2 * emb)
    # Per-batch-row streaming bytes (double-buffered in/out) + f32 temporaries.
    per_row_p1 = 2 * (2 * C) + 2 * (2 * n_mid) + 12 * n_mid
    per_row_p2 = 2 * (2 * n_mid) + 2 * (4 * emb)
    per_row = max(per_row_p1, per_row_p2)
    avail = max(vmem_budget - resident, per_row * _B_ALIGN)
    cap = max(_B_ALIGN, (avail // per_row) // _B_ALIGN * _B_ALIGN)
    tile = min(1024, cap, b_full)
    # Keep >= 2 batch tiles when the batch allows it so the "parallel" grid can
    # be sharded across both TensorCores on v7x (nearly free on 1-TC chips).
    if b_full >= 2 * _B_ALIGN and tile >= b_full:
        tile = _round_up((b_full + 1) // 2, _B_ALIGN)
    return tile, b_full


# --------------------------------------------------------------------------- #
# Pass 1: projection (stand-in backbone head) + LayerNorm + packed BN sums
# --------------------------------------------------------------------------- #
def _proj_ln_stats_kernel(pooled_ref, wp_ref, bp_ref, ln_g_ref, ln_b_ref,
                          y_ref, stat_ref, *, n_valid_last, has_batch_pad):
    # Stand-in backbone projection: (TB, C) @ (C, n_mid) on the MXU,
    # bf16 operands (cast in the wrapper), f32 accumulation.
    feat = jnp.dot(pooled_ref[...], wp_ref[...],
                   preferred_element_type=jnp.float32) + bp_ref[...]

    # fc[0]: LayerNorm over the feature (lane) axis, one-pass moments.
    mu = jnp.mean(feat, axis=-1, keepdims=True)
    msq = jnp.mean(feat * feat, axis=-1, keepdims=True)
    var = jnp.maximum(msq - mu * mu, 0.0)
    y = (feat - mu) * jax.lax.rsqrt(var + LN_EPS)
    y = y * ln_g_ref[...] + ln_b_ref[...]

    # Store y in bf16 (halves the HBM round-trip feeding pass 2).
    y_bf = y.astype(y_ref.dtype)
    y_ref[...] = y_bf

    # Per-tile partial sums for the global train-mode BatchNorm1d statistics.
    # Accumulated in f32 from the *stored* (bf16) activations so pass 2
    # normalizes exactly the values it reads back.
    ys = y_bf.astype(jnp.float32)

    def _pack(v):
        s = jnp.sum(v, axis=0, keepdims=True)          # (1, n_mid)
        sq = jnp.sum(v * v, axis=0, keepdims=True)     # (1, n_mid)
        rid = jax.lax.broadcasted_iota(jnp.int32, (8, s.shape[-1]), 0)
        # sublane 0 = sum(y), sublane 1 = sum(y*y), sublanes 2..7 = 0
        return jnp.where(rid == 0, s, jnp.where(rid == 1, sq, 0.0))

    if not has_batch_pad:                 # static: no batch padding anywhere
        stat_ref[...] = _pack(ys)
    else:
        last = pl.num_programs(0) - 1

        @pl.when(pl.program_id(0) != last)
        def _():
            stat_ref[...] = _pack(ys)

        @pl.when(pl.program_id(0) == last)
        def _():
            # Only the last tile contains batch-padding rows; mask them out of
            # the statistics (they never affect real outputs).
            row = jax.lax.broadcasted_iota(jnp.int32, (ys.shape[0], 1), 0)
            stat_ref[...] = _pack(jnp.where(row < n_valid_last, ys, 0.0))


# --------------------------------------------------------------------------- #
# Pass 2: Linear with the BatchNorm affine folded into its weights
# --------------------------------------------------------------------------- #
def _bn_linear_kernel(y_ref, w_ref, b_ref, out_ref):
    # fc[1] + fc[2]: BN affine was folded into (w_ref, b_ref) in the wrapper,
    # so this is a pure MXU matmul (bf16 operands, f32 accumulation) + bias.
    out_ref[...] = jnp.dot(y_ref[...], w_ref[...],
                           preferred_element_type=jnp.float32) + b_ref[...]


def feature_extractor(x, params):
    """x: (B, C, H, W) float32. Returns (B, embedding_size) float32."""
    B, C, H, W = x.shape
    n_mid = params["ln_gamma"].shape[-1]
    emb = params["fc_w"].shape[-1]
    f32, bf16 = jnp.float32, jnp.bfloat16

    # Stand-in backbone GAP outside the kernel: kernel only ingests (B, C),
    # with C on the lane axis (already MXU-friendly).
    pooled = jnp.mean(x.reshape(B, C, H * W), axis=-1)

    tile_b, b_full = _pick_tile_b(B, C, n_mid, emb, VMEM_LIMIT_BYTES)
    b_pad = _round_up(b_full, tile_b)
    n_tiles = b_pad // tile_b
    n_valid_last = B - (n_tiles - 1) * tile_b

    # bf16 MXU operands produced once here (not per grid step in the kernel).
    pooled = jnp.pad(pooled, ((0, b_pad - B), (0, 0))).astype(bf16)
    proj_w = params["proj_w"].astype(bf16)

    compiler_params = pltpu.CompilerParams(
        # Batch tiles are fully independent in both passes.
        dimension_semantics=("parallel",),
        vmem_limit_bytes=VMEM_LIMIT_BYTES,
    )

    # ---------------- Pass 1: projection + LayerNorm + packed BN sums -------
    cost1 = pl.CostEstimate(
        flops=2 * b_pad * C * n_mid + 8 * b_pad * n_mid,
        transcendentals=b_pad,
        bytes_accessed=(2 * b_pad * C + 2 * C * n_mid + 4 * 3 * n_mid
                        + 2 * b_pad * n_mid + 4 * 8 * n_tiles * n_mid),
    )
    y_bf, stats = pl.pallas_call(
        functools.partial(_proj_ln_stats_kernel,
                          n_valid_last=n_valid_last,
                          has_batch_pad=(b_pad != B)),
        grid=(n_tiles,),
        in_specs=[
            pl.BlockSpec((tile_b, C), lambda b: (b, 0)),     # pooled batch tile
            # Constant-index weight block (resident). For very large C consider
            # pinning it to a single buffer to free VMEM for bigger batch tiles.
            pl.BlockSpec((C, n_mid), lambda b: (0, 0)),      # proj_w (bf16)
            pl.BlockSpec((1, n_mid), lambda b: (0, 0)),      # proj_b
            pl.BlockSpec((1, n_mid), lambda b: (0, 0)),      # ln_gamma
            pl.BlockSpec((1, n_mid), lambda b: (0, 0)),      # ln_beta
        ],
        out_specs=(
            pl.BlockSpec((tile_b, n_mid), lambda b: (b, 0)),  # y (bf16)
            pl.BlockSpec((8, n_mid), lambda b: (b, 0)),       # packed BN sums
        ),
        out_shape=(
            jax.ShapeDtypeStruct((b_pad, n_mid), bf16),
            jax.ShapeDtypeStruct((8 * n_tiles, n_mid), f32),
        ),
        compiler_params=compiler_params,
        cost_estimate=cost1,
    )(pooled, proj_w, params["proj_b"], params["ln_gamma"], params["ln_beta"])

    # ---- Finalize global train-mode BatchNorm1d statistics (tiny XLA) ------
    stats = stats.reshape(n_tiles, 8, n_mid)
    sum_y = jnp.sum(stats[:, 0, :], axis=0, keepdims=True)
    sum_yy = jnp.sum(stats[:, 1, :], axis=0, keepdims=True)
    bmu = sum_y / B
    bvar = jnp.maximum(sum_yy / B - bmu * bmu, 0.0)      # biased var, clamped

    # ---- Fold the BatchNorm affine into the Linear layer --------------------
    a = params["bn_gamma"] * jax.lax.rsqrt(bvar + BN_EPS)          # (1, n_mid)
    c = params["bn_beta"] - bmu * a                                 # (1, n_mid)
    w_fold = (a.reshape(n_mid, 1) * params["fc_w"]).astype(bf16)    # (n_mid, emb)
    b_fold = params["fc_b"] + c @ params["fc_w"]                    # (1, emb) f32

    # ---------------- Pass 2: (BN ∘ Linear) as one matmul --------------------
    cost2 = pl.CostEstimate(
        flops=2 * b_pad * n_mid * emb,
        transcendentals=0,
        bytes_accessed=(2 * b_pad * n_mid + 2 * n_mid * emb + 4 * emb
                        + 4 * b_pad * emb),
    )
    out = pl.pallas_call(
        _bn_linear_kernel,
        grid=(n_tiles,),
        in_specs=[
            pl.BlockSpec((tile_b, n_mid), lambda b: (b, 0)),  # y batch tile (bf16)
            pl.BlockSpec((n_mid, emb), lambda b: (0, 0)),     # folded W (bf16)
            pl.BlockSpec((1, emb), lambda b: (0, 0)),         # folded bias (f32)
        ],
        out_specs=pl.BlockSpec((tile_b, emb), lambda b: (b, 0)),
        out_shape=jax.ShapeDtypeStruct((b_pad, emb), f32),
        compiler_params=compiler_params,
        cost_estimate=cost2,
    )(y_bf, w_fold, b_fold)

    return out[:B]


def init_params(key, C, n_mid=1024, embedding_size=128):
    k1, k2 = jax.random.split(key, 2)
    return {
        # stand-in backbone projection
        "proj_w": jax.random.normal(k1, (C, n_mid), jnp.float32) * 0.02,
        "proj_b": jnp.zeros((1, n_mid), jnp.float32),
        # nn.LayerNorm(n_mid) defaults
        "ln_gamma": jnp.ones((1, n_mid), jnp.float32),
        "ln_beta": jnp.zeros((1, n_mid), jnp.float32),
        # nn.BatchNorm1d(n_mid) defaults (affine)
        "bn_gamma": jnp.ones((1, n_mid), jnp.float32),
        "bn_beta": jnp.zeros((1, n_mid), jnp.float32),
        # nn.Linear(n_mid, embedding_size): weight passed as (n_mid, emb)
        "fc_w": jax.random.normal(k2, (n_mid, embedding_size), jnp.float32) * 0.02,
        "fc_b": jnp.zeros((1, embedding_size), jnp.float32),
    }


def _reference(x, params, *, bf16_matmuls):
    """Pure-JAX reference: GAP -> proj -> LayerNorm -> BatchNorm1d(train) -> Linear.

    bf16_matmuls=True mirrors the kernel's precision choices exactly (bf16
    operands at every MXU boundary, bf16-stored y, folded BN affine, f32 stats).
    """
    B, C, H, W = x.shape
    f32 = jnp.float32

    def cast(v):
        return v.astype(jnp.bfloat16) if bf16_matmuls else v

    pooled = jnp.mean(x.reshape(B, C, H * W), axis=-1)
    feat = jnp.dot(cast(pooled), cast(params["proj_w"]),
                   preferred_element_type=f32) + params["proj_b"]
    mu = jnp.mean(feat, axis=-1, keepdims=True)
    var = jnp.maximum(jnp.mean(feat * feat, axis=-1, keepdims=True) - mu * mu, 0.0)
    y = (feat - mu) * jax.lax.rsqrt(var + LN_EPS)
    y = y * params["ln_gamma"] + params["ln_beta"]

    y_stored = cast(y).astype(f32)                 # kernel stores y as bf16
    bmu = jnp.mean(y_stored, axis=0, keepdims=True)
    bvar = jnp.maximum(jnp.mean(y_stored * y_stored, axis=0, keepdims=True)
                       - bmu * bmu, 0.0)

    a = params["bn_gamma"] * jax.lax.rsqrt(bvar + BN_EPS)
    c = params["bn_beta"] - bmu * a
    w_fold = cast(a.reshape(-1, 1) * params["fc_w"])
    b_fold = params["fc_b"] + c @ params["fc_w"]
    return jnp.dot(cast(y), w_fold, preferred_element_type=f32) + b_fold


if __name__ == "__main__":
    key = jax.random.PRNGKey(0)
    kx, kp = jax.random.split(key)

    B, C, H, W = 2, 4, 16, 16
    n_mid, emb = 1024, 128

    x = jax.random.normal(kx, (B, C, H, W), jnp.float32)
    params = init_params(kp, C, n_mid=n_mid, embedding_size=emb)

    out = jax.jit(feature_extractor)(x, params)
    out = jax.block_until_ready(out)
    assert out.shape == (B, emb), out.shape
    assert bool(jnp.all(jnp.isfinite(out))), "non-finite output"

    # Strict check against a pure-JAX mirror of the kernel computation (same
    # bf16 casting points, same folded-BN formulation, f32 statistics).
    ref_mirror = _reference(x, params, bf16_matmuls=True)
    assert jnp.allclose(out, ref_mirror, atol=2e-2, rtol=2e-2), \
        "mismatch vs kernel-precision reference"

    # Loose sanity check vs full-f32 PyTorch semantics: batch=2 training-mode
    # BatchNorm has near-degenerate per-feature variances, which amplifies the
    # intentional bf16 rounding on a few features, hence the wide tolerance.
    ref_f32 = _reference(x, params, bf16_matmuls=False)
    assert jnp.allclose(out, ref_f32, atol=0.35, rtol=0.1), \
        "mismatch vs f32 reference"

    print("KERNEL_OK")
</pallas_src>

<mosaic_0001>
module attributes {stable_mosaic.version = 11 : i64} {
  func.func @_proj_ln_stats_kernel(%arg0: i32, %arg1: memref<16x4xbf16, #tpu.memory_space<vmem>>, %arg2: memref<4x1024xbf16, #tpu.memory_space<vmem>>, %arg3: memref<1x1024xf32, #tpu.memory_space<vmem>>, %arg4: memref<1x1024xf32, #tpu.memory_space<vmem>>, %arg5: memref<1x1024xf32, #tpu.memory_space<vmem>>, %arg6: memref<16x1024xbf16, #tpu.memory_space<vmem>>, %arg7: memref<8x1024xf32, #tpu.memory_space<vmem>>) attributes {dimension_semantics = [#tpu.dimension_semantics<parallel>], iteration_bounds = array<i64: 1>, scalar_prefetch = 0 : i64, scratch_operands = 0 : i64, tpu.core_type = #tpu.core_type<tc>, window_params = [{transform_indices = @transform_0, window_bounds = array<i64: 16, 4>}, {pipeline_mode = #tpu.pipeline_mode<synchronous>, transform_indices = @transform_1, window_bounds = array<i64: 4, 1024>}, {pipeline_mode = #tpu.pipeline_mode<synchronous>, transform_indices = @transform_2, window_bounds = array<i64: 1, 1024>}, {pipeline_mode = #tpu.pipeline_mode<synchronous>, transform_indices = @transform_3, window_bounds = array<i64: 1, 1024>}, {pipeline_mode = #tpu.pipeline_mode<synchronous>, transform_indices = @transform_4, window_bounds = array<i64: 1, 1024>}, {transform_indices = @transform_5, window_bounds = array<i64: 16, 1024>}, {transform_indices = @transform_6, window_bounds = array<i64: 8, 1024>}]} {
    %c0 = arith.constant 0 : index
    %c0_0 = arith.constant 0 : index
    %0 = vector.load %arg1[%c0, %c0_0] : memref<16x4xbf16, #tpu.memory_space<vmem>>, vector<16x4xbf16>
    %c0_1 = arith.constant 0 : index
    %c0_2 = arith.constant 0 : index
    %1 = vector.load %arg2[%c0_1, %c0_2] : memref<4x1024xbf16, #tpu.memory_space<vmem>>, vector<4x1024xbf16>
    %cst = arith.constant dense<0.000000e+00> : vector<16x1024xf32>
    %2 = tpu.matmul %0, %1, %cst {dimension_numbers = #tpu.dot_dimension_numbers<[1], [0], [0], [1], [0, 0, 1, 1], [], []>} : vector<16x4xbf16>, vector<4x1024xbf16>, vector<16x1024xf32> -> vector<16x1024xf32>
    %c0_3 = arith.constant 0 : index
    %c0_4 = arith.constant 0 : index
    %3 = vector.load %arg3[%c0_3, %c0_4] : memref<1x1024xf32, #tpu.memory_space<vmem>>, vector<1x1024xf32>
    %4 = vector.broadcast %3 : vector<1x1024xf32> to vector<16x1024xf32>
    %5 = arith.addf %2, %4 : vector<16x1024xf32>
    %cst_5 = arith.constant dense<0.000000e+00> : vector<16xf32>
    %6 = vector.multi_reduction <add>, %5, %cst_5 [1] : vector<16x1024xf32> to vector<16xf32>
    %7 = vector.shape_cast %6 : vector<16xf32> to vector<16x1xf32>
    %cst_6 = arith.constant 1.024000e+03 : f32
    %8 = vector.broadcast %cst_6 : f32 to vector<16x1xf32>
    %9 = arith.divf %7, %8 : vector<16x1xf32>
    %10 = arith.mulf %5, %5 : vector<16x1024xf32>
    %cst_7 = arith.constant dense<0.000000e+00> : vector<16xf32>
    %11 = vector.multi_reduction <add>, %10, %cst_7 [1] : vector<16x1024xf32> to vector<16xf32>
    %12 = vector.shape_cast %11 : vector<16xf32> to vector<16x1xf32>
    %cst_8 = arith.constant 1.024000e+03 : f32
    %13 = vector.broadcast %cst_8 : f32 to vector<16x1xf32>
    %14 = arith.divf %12, %13 : vector<16x1xf32>
    %15 = arith.mulf %9, %9 : vector<16x1xf32>
    %16 = arith.subf %14, %15 : vector<16x1xf32>
    %cst_9 = arith.constant 0.000000e+00 : f32
    %17 = vector.broadcast %cst_9 : f32 to vector<16x1xf32>
    %18 = arith.maximumf %16, %17 : vector<16x1xf32>
    %19 = vector.broadcast %9 : vector<16x1xf32> to vector<16x1024xf32>
    %20 = arith.subf %5, %19 : vector<16x1024xf32>
    %cst_10 = arith.constant 9.99999974E-6 : f32
    %21 = vector.broadcast %cst_10 : f32 to vector<16x1xf32>
    %22 = arith.addf %18, %21 : vector<16x1xf32>
    %23 = math.rsqrt %22 : vector<16x1xf32>
    %24 = vector.broadcast %23 : vector<16x1xf32> to vector<16x1024xf32>
    %25 = arith.mulf %20, %24 : vector<16x1024xf32>
    %c0_11 = arith.constant 0 : index
    %c0_12 = arith.constant 0 : index
    %26 = vector.load %arg4[%c0_11, %c0_12] : memref<1x1024xf32, #tpu.memory_space<vmem>>, vector<1x1024xf32>
    %27 = vector.broadcast %26 : vector<1x1024xf32> to vector<16x1024xf32>
    %28 = arith.mulf %25, %27 : vector<16x1024xf32>
    %c0_13 = arith.constant 0 : index
    %c0_14 = arith.constant 0 : index
    %29 = vector.load %arg5[%c0_13, %c0_14] : memref<1x1024xf32, #tpu.memory_space<vmem>>, vector<1x1024xf32>
    %30 = vector.broadcast %29 : vector<1x1024xf32> to vector<16x1024xf32>
    %31 = arith.addf %28, %30 : vector<16x1024xf32>
    %32 = arith.truncf %31 : vector<16x1024xf32> to vector<16x1024xbf16>
    %c0_15 = arith.constant 0 : index
    %c0_16 = arith.constant 0 : index
    %33 = vector.load %arg6[%c0_15, %c0_16] : memref<16x1024xbf16, #tpu.memory_space<vmem>>, vector<16x1024xbf16>
    tpu.vector_store %arg6[%c0_15, %c0_16], %32 {strides = array<i32>} : memref<16x1024xbf16, #tpu.memory_space<vmem>>, vector<16x1024xbf16>,
    %34 = arith.extf %32 : vector<16x1024xbf16> to vector<16x1024xf32>
    %c0_i32 = arith.constant 0 : i32
    %35 = arith.cmpi ne, %arg0, %c0_i32 : i32
    %36 = arith.extui %35 : i1 to i32
    %c0_i32_17 = arith.constant 0 : i32
    %37 = arith.cmpi ne, %36, %c0_i32_17 : i32
    scf.if %37 {
      %cst_20 = arith.constant dense<0.000000e+00> : vector<1024xf32>
      %41 = vector.multi_reduction <add>, %34, %cst_20 [0] : vector<16x1024xf32> to vector<1024xf32>
      %42 = vector.shape_cast %41 : vector<1024xf32> to vector<1x1024xf32>
      %43 = arith.mulf %34, %34 : vector<16x1024xf32>
      %cst_21 = arith.constant dense<0.000000e+00> : vector<1024xf32>
      %44 = vector.multi_reduction <add>, %43, %cst_21 [0] : vector<16x1024xf32> to vector<1024xf32>
      %45 = vector.shape_cast %44 : vector<1024xf32> to vector<1x1024xf32>
      %46 = tpu.iota {dimensions = array<i32: 0>} : vector<8x1024xi32>
      %c0_i32_22 = arith.constant 0 : i32
      %47 = vector.broadcast %c0_i32_22 : i32 to vector<8x1024xi32>
      %48 = arith.cmpi eq, %46, %47 : vector<8x1024xi32>
      %c1_i32 = arith.constant 1 : i32
      %49 = vector.broadcast %c1_i32 : i32 to vector<8x1024xi32>
      %50 = arith.cmpi eq, %46, %49 : vector<8x1024xi32>
      %cst_23 = arith.constant 0.000000e+00 : f32
      %51 = vector.shape_cast %45 : vector<1x1024xf32> to vector<1x1024xf32>
      %52 = vector.broadcast %51 : vector<1x1024xf32> to vector<8x1024xf32>
      %53 = vector.broadcast %cst_23 : f32 to vector<8x1024xf32>
      %54 = arith.select %50, %52, %53 : vector<8x1024xi1>, vector<8x1024xf32>
      %55 = vector.shape_cast %42 : vector<1x1024xf32> to vector<1x1024xf32>
      %56 = vector.broadcast %55 : vector<1x1024xf32> to vector<8x1024xf32>
      %57 = arith.select %48, %56, %54 : vector<8x1024xi1>, vector<8x1024xf32>
      %c0_24 = arith.constant 0 : index
      %c0_25 = arith.constant 0 : index
      %58 = vector.load %arg7[%c0_24, %c0_25] : memref<8x1024xf32, #tpu.memory_space<vmem>>, vector<8x1024xf32>
      tpu.vector_store %arg7[%c0_24, %c0_25], %57 {strides = array<i32>} : memref<8x1024xf32, #tpu.memory_space<vmem>>, vector<8x1024xf32>,
    } else {
    }
    %c0_i32_18 = arith.constant 0 : i32
    %38 = arith.cmpi eq, %arg0, %c0_i32_18 : i32
    %39 = arith.extui %38 : i1 to i32
    %c0_i32_19 = arith.constant 0 : i32
    %40 = arith.cmpi ne, %39, %c0_i32_19 : i32
    scf.if %40 {
      %41 = tpu.iota {dimensions = array<i32: 0>} : vector<16x1xi32>
      %c2_i32 = arith.constant 2 : i32
      %42 = vector.broadcast %c2_i32 : i32 to vector<16x1xi32>
      %43 = arith.cmpi slt, %41, %42 : vector<16x1xi32>
      %cst_20 = arith.constant 0.000000e+00 : f32
      %44 = vector.shape_cast %43 : vector<16x1xi1> to vector<16x1xi1>
      %45 = vector.broadcast %44 : vector<16x1xi1> to vector<16x1024xi1>
      %46 = vector.broadcast %cst_20 : f32 to vector<16x1024xf32>
      %47 = arith.select %45, %34, %46 : vector<16x1024xi1>, vector<16x1024xf32>
      %cst_21 = arith.constant dense<0.000000e+00> : vector<1024xf32>
      %48 = vector.multi_reduction <add>, %47, %cst_21 [0] : vector<16x1024xf32> to vector<1024xf32>
      %49 = vector.shape_cast %48 : vector<1024xf32> to vector<1x1024xf32>
      %50 = arith.mulf %47, %47 : vector<16x1024xf32>
      %cst_22 = arith.constant dense<0.000000e+00> : vector<1024xf32>
      %51 = vector.multi_reduction <add>, %50, %cst_22 [0] : vector<16x1024xf32> to vector<1024xf32>
      %52 = vector.shape_cast %51 : vector<1024xf32> to vector<1x1024xf32>
      %53 = tpu.iota {dimensions = array<i32: 0>} : vector<8x1024xi32>
      %c0_i32_23 = arith.constant 0 : i32
      %54 = vector.broadcast %c0_i32_23 : i32 to vector<8x1024xi32>
      %55 = arith.cmpi eq, %53, %54 : vector<8x1024xi32>
      %c1_i32 = arith.constant 1 : i32
      %56 = vector.broadcast %c1_i32 : i32 to vector<8x1024xi32>
      %57 = arith.cmpi eq, %53, %56 : vector<8x1024xi32>
      %cst_24 = arith.constant 0.000000e+00 : f32
      %58 = vector.shape_cast %52 : vector<1x1024xf32> to vector<1x1024xf32>
      %59 = vector.broadcast %58 : vector<1x1024xf32> to vector<8x1024xf32>
      %60 = vector.broadcast %cst_24 : f32 to vector<8x1024xf32>
      %61 = arith.select %57, %59, %60 : vector<8x1024xi1>, vector<8x1024xf32>
      %62 = vector.shape_cast %49 : vector<1x1024xf32> to vector<1x1024xf32>
      %63 = vector.broadcast %62 : vector<1x1024xf32> to vector<8x1024xf32>
      %64 = arith.select %55, %63, %61 : vector<8x1024xi1>, vector<8x1024xf32>
      %c0_25 = arith.constant 0 : index
      %c0_26 = arith.constant 0 : index
      %65 = vector.load %arg7[%c0_25, %c0_26] : memref<8x1024xf32, #tpu.memory_space<vmem>>, vector<8x1024xf32>
      tpu.vector_store %arg7[%c0_25, %c0_26], %64 {strides = array<i32>} : memref<8x1024xf32, #tpu.memory_space<vmem>>, vector<8x1024xf32>,
    } else {
    }
    return
  }
  func.func @transform_0(%arg0: i32) -> (i32, i32) {
    %c0_i32 = arith.constant 0 : i32
    %c0_i32_0 = arith.constant 0 : i32
    return %arg0, %c0_i32 : i32, i32
  }
  func.func @transform_1(%arg0: i32) -> (i32, i32) {
    %c0_i32 = arith.constant 0 : i32
    %c0_i32_0 = arith.constant 0 : i32
    %c0_i32_1 = arith.constant 0 : i32
    return %c0_i32, %c0_i32_0 : i32, i32
  }
  func.func @transform_2(%arg0: i32) -> (i32, i32) {
    %c0_i32 = arith.constant 0 : i32
    %c0_i32_0 = arith.constant 0 : i32
    %c0_i32_1 = arith.constant 0 : i32
    return %c0_i32, %c0_i32_0 : i32, i32
  }
  func.func @transform_3(%arg0: i32) -> (i32, i32) {
    %c0_i32 = arith.constant 0 : i32
    %c0_i32_0 = arith.constant 0 : i32
    %c0_i32_1 = arith.constant 0 : i32
    return %c0_i32, %c0_i32_0 : i32, i32
  }
  func.func @transform_4(%arg0: i32) -> (i32, i32) {
    %c0_i32 = arith.constant 0 : i32
    %c0_i32_0 = arith.constant 0 : i32
    %c0_i32_1 = arith.constant 0 : i32
    return %c0_i32, %c0_i32_0 : i32, i32
  }
  func.func @transform_5(%arg0: i32) -> (i32, i32) {
    %c0_i32 = arith.constant 0 : i32
    %c0_i32_0 = arith.constant 0 : i32
    return %arg0, %c0_i32 : i32, i32
  }
  func.func @transform_6(%arg0: i32) -> (i32, i32) {
    %c0_i32 = arith.constant 0 : i32
    %c0_i32_0 = arith.constant 0 : i32
    return %arg0, %c0_i32 : i32, i32
  }
}

module attributes {stable_mosaic.version = 11 : i64} {
  func.func @_bn_linear_kernel(%arg0: i32, %arg1: memref<16x1024xbf16, #tpu.memory_space<vmem>>, %arg2: memref<1024x128xbf16, #tpu.memory_space<vmem>>, %arg3: memref<1x128xf32, #tpu.memory_space<vmem>>, %arg4: memref<16x128xf32, #tpu.memory_space<vmem>>) attributes {dimension_semantics = [#tpu.dimension_semantics<parallel>], iteration_bounds = array<i64: 1>, scalar_prefetch = 0 : i64, scratch_operands = 0 : i64, tpu.core_type = #tpu.core_type<tc>, window_params = [{transform_indices = @transform_0, window_bounds = array<i64: 16, 1024>}, {pipeline_mode = #tpu.pipeline_mode<synchronous>, transform_indices = @transform_1, window_bounds = array<i64: 1024, 128>}, {pipeline_mode = #tpu.pipeline_mode<synchronous>, transform_indices = @transform_2, window_bounds = array<i64: 1, 128>}, {transform_indices = @transform_3, window_bounds = array<i64: 16, 128>}]} {
    %c0 = arith.constant 0 : index
    %c0_0 = arith.constant 0 : index
    %0 = vector.load %arg1[%c0, %c0_0] : memref<16x1024xbf16, #tpu.memory_space<vmem>>, vector<16x1024xbf16>
    %c0_1 = arith.constant 0 : index
    %c0_2 = arith.constant 0 : index
    %1 = vector.load %arg2[%c0_1, %c0_2] : memref<1024x128xbf16, #tpu.memory_space<vmem>>, vector<1024x128xbf16>
    %cst = arith.constant dense<0.000000e+00> : vector<16x128xf32>
    %2 = tpu.matmul %0, %1, %cst {dimension_numbers = #tpu.dot_dimension_numbers<[1], [0], [0], [1], [0, 0, 1, 1], [], []>} : vector<16x1024xbf16>, vector<1024x128xbf16>, vector<16x128xf32> -> vector<16x128xf32>
    %c0_3 = arith.constant 0 : index
    %c0_4 = arith.constant 0 : index
    %3 = vector.load %arg3[%c0_3, %c0_4] : memref<1x128xf32, #tpu.memory_space<vmem>>, vector<1x128xf32>
    %4 = vector.broadcast %3 : vector<1x128xf32> to vector<16x128xf32>
    %5 = arith.addf %2, %4 : vector<16x128xf32>
    %c0_5 = arith.constant 0 : index
    %c0_6 = arith.constant 0 : index
    %6 = vector.load %arg4[%c0_5, %c0_6] : memref<16x128xf32, #tpu.memory_space<vmem>>, vector<16x128xf32>
    tpu.vector_store %arg4[%c0_5, %c0_6], %5 {strides = array<i32>} : memref<16x128xf32, #tpu.memory_space<vmem>>, vector<16x128xf32>,
    return
  }
  func.func @transform_0(%arg0: i32) -> (i32, i32) {
    %c0_i32 = arith.constant 0 : i32
    %c0_i32_0 = arith.constant 0 : i32
    return %arg0, %c0_i32 : i32, i32
  }
  func.func @transform_1(%arg0: i32) -> (i32, i32) {
    %c0_i32 = arith.constant 0 : i32
    %c0_i32_0 = arith.constant 0 : i32
    %c0_i32_1 = arith.constant 0 : i32
    return %c0_i32, %c0_i32_0 : i32, i32
  }
  func.func @transform_2(%arg0: i32) -> (i32, i32) {
    %c0_i32 = arith.constant 0 : i32
    %c0_i32_0 = arith.constant 0 : i32
    %c0_i32_1 = arith.constant 0 : i32
    return %c0_i32, %c0_i32_0 : i32, i32
  }
  func.func @transform_3(%arg0: i32) -> (i32, i32) {
    %c0_i32 = arith.constant 0 : i32
    %c0_i32_0 = arith.constant 0 : i32
    return %arg0, %c0_i32 : i32, i32
  }
}

</mosaic_0001>

<bundles_post_ra>
// kernel: feature_extractor.2
= control target key start
LH: loop header
LB: loop body
LE: loop exit
PB: predicated region body
PF: predicated region fallthrough
CT: control target
= control target key end

     0   :  { %v29_v0 = vlaneseq  ;;  %v983_v3 = vmov 1983009808   ;;  %v984_v5 = vmov 0   ;;  %vm114_vm0 = vcmask 1041408   ;;  %s1392_s1 = inlined_call_operand.vmem [shape: bf16[4,1024], index: 1, kind: input, shape index: {}]   ;;  %s1393_s0 = inlined_call_operand.vmem [shape: bf16[16,4], index: 0, kind: input, shape index: {}]   ;;  %s1394_s2 = inlined_call_operand.vmem [shape: f32[1,1024], index: 2, kind: input, shape index: {}]   ;;  %s1395_s3 = inlined_call_operand.vmem [shape: f32[1,1024], index: 3, kind: input, shape index: {}]   ;;  %s1396_s4 = inlined_call_operand.vmem [shape: f32[1,1024], index: 4, kind: input, shape index: {}]   ;;  %s1397_s5 = inlined_call_operand.vmem [shape: bf16[16,1024], index: 5, kind: output, shape index: {0}]   ;;  %s1398_s6 = inlined_call_operand.vmem [shape: f32[8,1024], index: 6, kind: output, shape index: {1}]  }
   0x1   :  { %v25_v1 = vld [vmem:[%s1392_s1] sm:$0xff]  ;;  %v26_v2 = vld [vmem:[%s1392_s1 + $0x8] sm:$0xff]  ;;  %v78_v4 = vunpack.c.l.s4 %v983_v3  ;;  %171 = vmatprep.mubr.bf16.mxu0 %v984_v5  ;;  %214 = vmatprep.mubr.bf16.mxu1 %v984_v5  ;;  %vm110_vm1 = vcmask 31744  }
   0x2   :  { %v1026_v6 = vshrl.u32 %v29_v0, 7  ;;  %v93_v8 = vcombine.high %v26_v2, %v26_v2  ;;  %v76_v9 = vcombine.high %v25_v1, %v25_v1  ;;  %v978_v21 = vld [vmem:[%s1393_s0] sm:$0xff]  }
   0x3   :  { %v79_v7 = vunpack.c.0.s8 %v78_v4  ;;  %v27_v26 = vld [vmem:[%s1394_s2] sm:$0xff] }
   0x4   :  { %v1041_v24 = vsub.s32 0, %v1026_v6  ;;  %v1044_v25 = vsub.s32 2, %v1026_v6  ;;  %v1050_v27 = vsub.s32 1, %v1026_v6  ;;  %v1053_v28 = vsub.s32 3, %v1026_v6 }
   0x5   :  { %v82_v10 = vsub.s32 %v79_v7, %v1026_v6  ;;  %v1059_v32 = vsub.s32 4, %v1026_v6  ;;  %v1062_v33 = vsub.s32 5, %v1026_v6  ;;  %v1070_v41 = vsub.s32 6, %v1026_v6 }
   0x6   :  { %v32_v29 = vrot.slane %v27_v26, %v1041_v24  ;;  %v40_v30 = vrot.slane %v27_v26, %v1044_v25  ;;  %v36_v31 = vrot.slane %v27_v26, %v1050_v27  ;;  %v44_v34 = vrot.slane %v27_v26, %v1053_v28 }
   0x7   :  { %v83_v11 = vrot.slane %v25_v1, %v82_v10  ;;  %v100_v12 = vrot.slane %v26_v2, %v82_v10  ;;  %v90_v13 = vrot.slane %v76_v9, %v82_v10  ;;  %v107_v14 = vrot.slane %v93_v8, %v82_v10 }
   0x8   :  { %v48_v45 = vrot.slane %v27_v26, %v1059_v32  ;;  %v52_v46 = vrot.slane %v27_v26, %v1062_v33  ;;  %v1077_v47 = vsub.s32 7, %v1026_v6  ;;  %v56_v61 = vrot.slane %v27_v26, %v1070_v41 }
   0x9   :  { %v91_v15 = vcombine.high %v83_v11, %v83_v11  ;;  %v116_v16 = vsel %vm114_vm0, %v83_v11, 0  ;;  %v92_v17 = vcombine.high %v90_v13, %v90_v13  ;;  %v122_v18 = vsel %vm114_vm0, %v90_v13, 0 }
   0xa   :  { %v108_v19 = vcombine.high %v100_v12, %v100_v12  ;;  %v109_v20 = vcombine.high %v107_v14, %v107_v14  ;;  %v128_v22 = vsel %vm114_vm0, %v100_v12, 0  ;;  %v134_v23 = vsel %vm114_vm0, %v107_v14, 0 }
   0xb   :  { %950 = vmatprep.subr.msk.bf16.mxu0 %vm114_vm0, %v91_v15  ;;  %952 = vmatprep.subr.msk.bf16.mxu1 %vm114_vm0, %v92_v17  ;;  %v60_v13 = vrot.slane %v27_v26, %v1077_v47  ;;  %vm765_vm2 = vcmp.lt.s32.totalorder %v1026_v6, 2  ;;  %vm916_vm3 = vcmp.eq.s32.totalorder %v1026_v6, 1  ;;  %vm915_vm4 = vcmp.eq.s32.totalorder %v1026_v6, 0 }
   0xc   :  { %140 = vmatpush1.bf16.msra.mxu0 %v116_v16  ;;  %183 = vmatpush1.bf16.msra.mxu1 %v122_v18 }
   0xd   :  { %954 = vmatprep.subr.msk.bf16.mxu0 %vm114_vm0, %v108_v19  ;;  %956 = vmatprep.subr.msk.bf16.mxu1 %vm114_vm0, %v109_v20 }
   0xf   :  { %951 = vmatmul.mubr.msk.bf16.vlgmr.msra.gmra.mrb[0].mxu0 %vm110_vm1, %v978_v21  ;;  %953 = vmatmul.mubr.msk.bf16.vlgmr.msra.gmra.mrb[0].mxu1 %vm110_vm1, %v978_v21 }
  0x10   :  { %226 = vmatpush1.bf16.msra.mxu0 %v128_v22  ;;  %269 = vmatpush1.bf16.msra.mxu1 %v134_v23 }
  0x11   :  { %257 = vmatprep.mubr.bf16.mxu0 %v984_v5  ;;  %300 = vmatprep.mubr.bf16.mxu1 %v984_v5 }
  0x17   :  { %955 = vmatmul.mubr.msk.bf16.vlgmr.msra.gmra.mrb[4].mxu0 %vm110_vm1, %v978_v21  ;;  %957 = vmatmul.mubr.msk.bf16.vlgmr.msra.gmra.mrb[4].mxu1 %vm110_vm1, %v978_v21 }
  0xe2   :  { %v173_v35 = vpop.f32.mrb[0].mxu0  ;;  %v216_v36 = vpop.f32.mrb[0].mxu1 }
  0xe3   :  { %v1065_v37 = vadd.f32 %v173_v35, %v32_v29  ;;  %v175_v38 = vpop.f32.mrb[1].mxu0  ;;  %v1067_v39 = vadd.f32 %v216_v36, %v40_v30  ;;  %v218_v40 = vpop.f32.mrb[1].mxu1 }
  0xe4   :  { %v1072_v42 = vadd.f32 %v175_v38, %v36_v31  ;;  %v177_v43 = vpop.f32.mrb[2].mxu0  ;;  %v220_v44 = vpop.f32.mrb[2].mxu1  ;;  %v1083_v51 = vadd.f32 %v218_v40, %v44_v34 }
  0xe5   :  { %v332_v48 = vmul.f32 %v1065_v37, %v1065_v37  ;;  %v1081_v49 = vadd.f32 %v177_v43, %v32_v29  ;;  %v179_v50 = vpop.f32.mrb[3].mxu0  ;;  %v1085_v52 = vadd.f32 %v220_v44, %v40_v30  ;;  %v222_v53 = vpop.f32.mrb[3].mxu1  ;;  %v334_v56 = vmul.f32 %v1067_v39, %v1067_v39 }
  0xe6   :  { %v311_v54 = vadd.f32 %v1072_v42, %v1065_v37  ;;  %v333_v55 = vmul.f32 %v1072_v42, %v1072_v42  ;;  %v1093_v57 = vadd.f32 %v179_v50, %v36_v31  ;;  %v1099_v60 = vadd.f32 %v222_v53, %v44_v34 }
  0xe7   :  { %v340_v58 = vmul.f32 %v1081_v49, %v1081_v49  ;;  %v342_v59 = vmul.f32 %v1085_v52, %v1085_v52  ;;  %v335_v2 = vmul.f32 %v1083_v51, %v1083_v51 }
  0xe8   :  { %v348_v62 = vadd.f32 %v333_v55, %v332_v48  ;;  %v312_v63 = vadd.f32 %v311_v54, %v1067_v39  ;;  %v320_v0 = vadd.f32 %v1093_v57, %v1081_v49  ;;  %v341_v1 = vmul.f32 %v1093_v57, %v1093_v57 }
  0xe9   :  { %v343_v10 = vmul.f32 %v1099_v60, %v1099_v60 }
  0xea   :  { %v349_v3 = vadd.f32 %v348_v62, %v334_v56  ;;  %v357_v4 = vadd.f32 %v341_v1, %v340_v58  ;;  %v313_v5 = vadd.f32 %v312_v63, %v1083_v51  ;;  %v321_v7 = vadd.f32 %v320_v0, %v1085_v52  ;;  %v259_v8 = vpop.f32.mrb[4].mxu0  ;;  %v302_v9 = vpop.f32.mrb[4].mxu1 }
  0xeb   :  { %v1113_v11 = vadd.f32 %v259_v8, %v48_v45  ;;  %v261_v12 = vpop.f32.mrb[5].mxu0  ;;  %v304_v14 = vpop.f32.mrb[5].mxu1  ;;  %v1119_v19 = vadd.f32 %v302_v9, %v56_v61 }
  0xec   :  { %v358_v15 = vadd.f32 %v357_v4, %v342_v59  ;;  %v322_v16 = vadd.f32 %v321_v7, %v1099_v60  ;;  %v1117_v17 = vadd.f32 %v261_v12, %v52_v46  ;;  %v263_v18 = vpop.f32.mrb[6].mxu0  ;;  %v306_v20 = vpop.f32.mrb[6].mxu1  ;;  %v350_v21 = vadd.f32 %v349_v3, %v335_v2 }
  0xed   :  { %v314_v22 = vadd.f32 %v313_v5, %v1113_v11  ;;  %v336_v23 = vmul.f32 %v1113_v11, %v1113_v11  ;;  %v1124_v29 = vadd.f32 %v263_v18, %v48_v45  ;;  %v265_v30 = vpop.f32.mrb[7].mxu0  ;;  %v308_v26 = vpop.f32.mrb[7].mxu1  ;;  %v1136_v44 = vadd.f32 %v304_v14, %v60_v13 }
  0xee   :  { %v359_v31 = vadd.f32 %v358_v15, %v343_v10  ;;  %v1126_v34 = vadd.f32 %v265_v30, %v52_v46  ;;  %v337_v35 = vmul.f32 %v1117_v17, %v1117_v17  ;;  %v1138_v45 = vadd.f32 %v306_v20, %v56_v61  ;;  %v410_v30 = vld [vmem:[%s1395_s3] sm:$0xff] }
  0xef   :  { %v323_v36 = vadd.f32 %v322_v16, %v1124_v29  ;;  %v344_v38 = vmul.f32 %v1124_v29, %v1124_v29  ;;  %v315_v40 = vadd.f32 %v314_v22, %v1117_v17  ;;  %v338_v46 = vmul.f32 %v1119_v19, %v1119_v19 }
  0xf0   :  { %v345_v43 = vmul.f32 %v1126_v34, %v1126_v34  ;;  %v351_v54 = vadd.f32 %v350_v21, %v336_v23  ;;  %v346_v62 = vmul.f32 %v1138_v45, %v1138_v45  ;;  %v1148_v61 = vadd.f32 %v308_v26, %v60_v13  ;;  %v468_v26 = vld [vmem:[%s1396_s4] sm:$0xff] }
  0xf1   :  { %v360_v48 = vadd.f32 %v359_v31, %v344_v38  ;;  %v324_v50 = vadd.f32 %v323_v36, %v1126_v34  ;;  %v316_v53 = vadd.f32 %v315_v40, %v1119_v19  ;;  %v339_v63 = vmul.f32 %v1136_v44, %v1136_v44 }
  0xf2   :  { %v352_v56 = vadd.f32 %v351_v54, %v337_v35  ;;  %v347_v4 = vmul.f32 %v1148_v61, %v1148_v61  ;;  %v1166_v35 = vrot.slane %v410_v30, %v1041_v24  ;;  %v1169_v38 = vrot.slane %v468_v26, %v1041_v24 }
  0xf3   :  { %v317_v55 = vadd.f32 %v316_v53, %v1136_v44  ;;  %v325_v58 = vadd.f32 %v324_v50, %v1138_v45  ;;  %v361_v59 = vadd.f32 %v360_v48, %v345_v43  ;;  %v1172_v40 = vrot.slane %v410_v30, %v1050_v27 }
  0xf4   :  { %v353_v0 = vadd.f32 %v352_v56, %v338_v46  ;;  %v1175_v43 = vrot.slane %v468_v26, %v1050_v27  ;;  %v1178_v46 = vrot.slane %v410_v30, %v1044_v25  ;;  %v1181_v48 = vrot.slane %v468_v26, %v1044_v25 }
  0xf5   :  { %318 = vadd.xlane.f32.xlu0 %v317_v55  ;;  %v326_v2 = vadd.f32 %v325_v58, %v1148_v61  ;;  %v362_v3 = vadd.f32 %v361_v59, %v346_v62  ;;  %v1184_v50 = vrot.slane %v410_v30, %v1053_v28  ;;  %v1187_v53 = vrot.slane %v468_v26, %v1053_v28 }
  0xf6   :  { %v354_v1 = vadd.f32 %v353_v0, %v339_v63  ;;  %v1190_v24 = vrot.slane %v410_v30, %v1059_v32  ;;  %v1193_v54 = vrot.slane %v468_v26, %v1059_v32  ;;  %v1196_v27 = vrot.slane %v410_v30, %v1062_v33 }
  0xf7   :  { %v363_v5 = vadd.f32 %v362_v3, %v347_v4  ;;  %v1199_v55 = vrot.slane %v468_v26, %v1062_v33  ;;  %v1202_v25 = vrot.slane %v410_v30, %v1070_v41  ;;  %v1205_v56 = vrot.slane %v468_v26, %v1070_v41 }
  0xf8   :  { %355 = vadd.xlane.f32.xlu1 %v354_v1  ;;  %v1208_v28 = vrot.slane %v410_v30, %v1077_v47  ;;  %v1211_v58 = vrot.slane %v468_v26, %v1077_v47 }
  0xf9   :  { %327 = vadd.xlane.f32.xlu0 %v326_v2 }
  0xfc   :  { %364 = vadd.xlane.f32.xlu1 %v363_v5 }
 0x182   :  { %v319_v7 = vpop.xlane.xlu0 %318 }
 0x183   :  { %v330_v8 = vmul.f32 0.0009765625, %v319_v7 }
 0x185   :  { %v356_v9 = vpop.xlane.xlu1 %355  ;;  %v368_v13 = vmul.f32 %v330_v8, %v330_v8  ;;  %v374_v32 = vsub.f32 %v1065_v37, %v330_v8  ;;  %v375_v59 = vsub.f32 %v1072_v42, %v330_v8  ;;  %v376_v62 = vsub.f32 %v1067_v39, %v330_v8 }
 0x186   :  { %v328_v10 = vpop.xlane.xlu0 %327  ;;  %v366_v12 = vmul.f32 0.0009765625, %v356_v9  ;;  %v377_v33 = vsub.f32 %v1083_v51, %v330_v8  ;;  %v378_v63 = vsub.f32 %v1113_v11, %v330_v8  ;;  %v379_v0 = vsub.f32 %v1117_v17, %v330_v8 }
 0x187   :  { %v1155_v14 = vmul.f32 0.0009765625, %v328_v10  ;;  %v380_v41 = vsub.f32 %v1119_v19, %v330_v8  ;;  %v381_v1 = vsub.f32 %v1136_v44, %v330_v8 }
 0x188   :  { %v370_v15 = vsub.f32 %v366_v12, %v368_v13 }
 0x189   :  { %v365_v16 = vpop.xlane.xlu1 %364  ;;  %v369_v21 = vmul.f32 %v1155_v14, %v1155_v14  ;;  %v382_v47 = vsub.f32 %v1081_v49, %v1155_v14  ;;  %v383_v37 = vsub.f32 %v1093_v57, %v1155_v14  ;;  %v384_v42 = vsub.f32 %v1085_v52, %v1155_v14 }
 0x18a   :  { %v372_v18 = vmax.f32 %v370_v15, 0.0  ;;  %v367_v20 = vmul.f32 0.0009765625, %v365_v16  ;;  %v385_v39 = vsub.f32 %v1099_v60, %v1155_v14  ;;  %v386_v11 = vsub.f32 %v1124_v29, %v1155_v14 }
 0x18b   :  { %v387_v17 = vsub.f32 %v1126_v34, %v1155_v14  ;;  %v388_v19 = vsub.f32 %v1138_v45, %v1155_v14  ;;  %v389_v49 = vsub.f32 %v1148_v61, %v1155_v14 }
 0x18c   :  { %v390_v22 = vadd.f32 1e-05, %v372_v18  ;;  %v371_v23 = vsub.f32 %v367_v20, %v369_v21 }
 0x18e   :  { %979 = vrsqrt.f32 %v390_v22  ;;  %v373_v31 = vmax.f32 %v371_v23, 0.0 }
 0x190   :  { %v391_v36 = vadd.f32 1e-05, %v373_v31 }
 0x192   :  { %981 = vrsqrt.f32 %v391_v36 }
 0x198   :  { %v980_v51 = vpop.eup %979 }
 0x199   :  { %v394_v57 = vmul.f32 %v980_v51, %v374_v32  ;;  %v395_v44 = vmul.f32 %v980_v51, %v375_v59  ;;  %v396_v2 = vmul.f32 %v980_v51, %v376_v62  ;;  %v397_v52 = vmul.f32 %v980_v51, %v377_v33 }
 0x19a   :  { %v398_v3 = vmul.f32 %v980_v51, %v378_v63  ;;  %v399_v4 = vmul.f32 %v980_v51, %v379_v0  ;;  %v400_v60 = vmul.f32 %v980_v51, %v380_v41  ;;  %v401_v5 = vmul.f32 %v980_v51, %v381_v1 }
 0x19b   :  { %v452_v7 = vmul.f32 %v1166_v35, %v394_v57  ;;  %v453_v29 = vmul.f32 %v1172_v40, %v395_v44  ;;  %v454_v34 = vmul.f32 %v1178_v46, %v396_v2  ;;  %v455_v8 = vmul.f32 %v1184_v50, %v397_v52 }
 0x19c   :  { %v982_v45 = vpop.eup %981  ;;  %v456_v9 = vmul.f32 %v1190_v24, %v398_v3  ;;  %v457_v61 = vmul.f32 %v1196_v27, %v399_v4  ;;  %v458_v10 = vmul.f32 %v1202_v25, %v400_v60  ;;  %v459_v12 = vmul.f32 %v1208_v28, %v401_v5 }
 0x19d   :  { %v510_v13 = vadd.f32 %v1169_v38, %v452_v7  ;;  %v511_v14 = vadd.f32 %v1175_v43, %v453_v29  ;;  %v512_v15 = vadd.f32 %v1181_v48, %v454_v34  ;;  %v513_v16 = vadd.f32 %v1187_v53, %v455_v8 }
 0x19e   :  { %v514_v18 = vadd.f32 %v1193_v54, %v456_v9  ;;  %v515_v20 = vadd.f32 %v1199_v55, %v457_v61  ;;  %v516_v21 = vadd.f32 %v1205_v56, %v458_v10  ;;  %v517_v22 = vadd.f32 %v1211_v58, %v459_v12 }
 0x19f   :  { %v966_v23 = vpack.c.bf16 %v511_v14, %v510_v13  ;;  %v967_v30 = vpack.c.bf16 %v513_v16, %v512_v15  ;;  %v402_v26 = vmul.f32 %v982_v45, %v382_v47  ;;  %v403_v31 = vmul.f32 %v982_v45, %v383_v37 }
 0x1a0   :  { %v968_v36 = vpack.c.bf16 %v515_v20, %v514_v18  ;;  %v969_v32 = vpack.c.bf16 %v517_v22, %v516_v21  ;;  %v404_v59 = vmul.f32 %v982_v45, %v384_v42  ;;  %v405_v62 = vmul.f32 %v982_v45, %v385_v39 }
 0x1a1   :  { %574 = vst [vmem:[%s1397_s5] sm:$0xff] %v966_v23  ;;  %575 = vst [vmem:[%s1397_s5 + $0x8] sm:$0xff] %v967_v30  ;;  %v406_v33 = vmul.f32 %v982_v45, %v386_v11  ;;  %v407_v63 = vmul.f32 %v982_v45, %v387_v17  ;;  %v408_v0 = vmul.f32 %v982_v45, %v388_v19 }
 0x1a2   :  { %v409_v41 = vmul.f32 %v982_v45, %v389_v49  ;;  %576 = vst [vmem:[%s1397_s5 + $0x10] sm:$0xff] %v968_v36  ;;  %577 = vst [vmem:[%s1397_s5 + $0x18] sm:$0xff] %v969_v32  ;;  %v460_v1 = vmul.f32 %v1166_v35, %v402_v26  ;;  %v461_v47 = vmul.f32 %v1172_v40, %v403_v31 }
 0x1a3   :  { %v462_v37 = vmul.f32 %v1178_v46, %v404_v59  ;;  %v463_v42 = vmul.f32 %v1184_v50, %v405_v62  ;;  %v464_v39 = vmul.f32 %v1190_v24, %v406_v33  ;;  %v465_v51 = vmul.f32 %v1196_v27, %v407_v63 }
 0x1a4   :  { %v466_v11 = vmul.f32 %v1202_v25, %v408_v0  ;;  %v467_v17 = vmul.f32 %v1208_v28, %v409_v41  ;;  %v518_v19 = vadd.f32 %v1169_v38, %v460_v1  ;;  %v519_v49 = vadd.f32 %v1175_v43, %v461_v47 }
 0x1a5   :  { %v520_v35 = vadd.f32 %v1181_v48, %v462_v37  ;;  %v521_v40 = vadd.f32 %v1187_v53, %v463_v42  ;;  %v522_v46 = vadd.f32 %v1193_v54, %v464_v39  ;;  %v523_v50 = vadd.f32 %v1199_v55, %v465_v51 }
 0x1a6   :  { %v524_v24 = vadd.f32 %v1205_v56, %v466_v11  ;;  %v525_v27 = vadd.f32 %v1211_v58, %v467_v17  ;;  %v526_v57 = vpack.c.bf16 %v518_v19, %v510_v13  ;;  %v527_v25 = vpack.c.bf16 %v519_v49, %v511_v14 }
 0x1a7   :  { %v528_v44 = vpack.c.bf16 %v520_v35, %v512_v15  ;;  %v529_v28 = vpack.c.bf16 %v521_v40, %v513_v16  ;;  %v530_v2 = vpack.c.bf16 %v522_v46, %v514_v18  ;;  %v531_v38 = vpack.c.bf16 %v523_v50, %v515_v20 }
 0x1a8   :  { %v532_v52 = vpack.c.bf16 %v524_v24, %v516_v21  ;;  %v533_v43 = vpack.c.bf16 %v525_v27, %v517_v22  ;;  %v970_v3 = vpack.c.bf16 %v519_v49, %v518_v19  ;;  %v971_v48 = vpack.c.bf16 %v521_v40, %v520_v35 }
 0x1a9   :  { %v972_v4 = vpack.c.bf16 %v523_v50, %v522_v46  ;;  %v973_v53 = vpack.c.bf16 %v525_v27, %v524_v24  ;;  %v582_v60 = vunpack.c.l.bf16 %v526_v57  ;;  %v583_v54 = vunpack.c.l.bf16 %v527_v25 }
 0x1aa   :  { %v584_v5 = vunpack.c.l.bf16 %v528_v44  ;;  %v585_v55 = vunpack.c.l.bf16 %v529_v28  ;;  %578 = vst [vmem:[%s1397_s5 + $0x20] sm:$0xff] %v970_v3  ;;  %579 = vst [vmem:[%s1397_s5 + $0x28] sm:$0xff] %v971_v48  ;;  %v586_v56 = vunpack.c.l.bf16 %v530_v2  ;;  %v587_v58 = vunpack.c.l.bf16 %v531_v38 }
 0x1ab   :  { %580 = vst [vmem:[%s1397_s5 + $0x30] sm:$0xff] %v972_v4  ;;  %581 = vst [vmem:[%s1397_s5 + $0x38] sm:$0xff] %v973_v53  ;;  %v588_v7 = vunpack.c.l.bf16 %v532_v52  ;;  %v589_v29 = vunpack.c.l.bf16 %v533_v43  ;;  %v771_v34 = vsel %vm765_vm2, %v582_v60, 0.0  ;;  %v772_v8 = vsel %vm765_vm2, %v583_v54, 0.0 }
 0x1ac   :  { %v773_v45 = vsel %vm765_vm2, %v584_v5, 0.0  ;;  %v774_v9 = vsel %vm765_vm2, %v585_v55, 0.0  ;;  %v775_v61 = vsel %vm765_vm2, %v586_v56, 0.0  ;;  %v776_v10 = vsel %vm765_vm2, %v587_v58, 0.0 }
 0x1ad   :  { %v777_v12 = vsel %vm765_vm2, %v588_v7, 0.0  ;;  %v778_v13 = vsel %vm765_vm2, %v589_v29, 0.0  ;;  %v788_v14 = vrot.slane %v771_v34, 4  ;;  %v795_v15 = vrot.slane %v772_v8, 4 }
 0x1ae   :  { %v802_v16 = vrot.slane %v773_v45, 4  ;;  %v809_v18 = vrot.slane %v774_v9, 4  ;;  %v816_v20 = vrot.slane %v775_v61, 4  ;;  %v823_v21 = vrot.slane %v776_v10, 4 }
 0x1af   :  { %v830_v22 = vrot.slane %v777_v12, 4  ;;  %v837_v23 = vrot.slane %v778_v13, 4  ;;  %v789_v30 = vadd.f32 %v788_v14, %v771_v34  ;;  %v796_v26 = vadd.f32 %v795_v15, %v772_v8 }
 0x1b0   :  { %v803_v31 = vadd.f32 %v802_v16, %v773_v45  ;;  %v810_v36 = vadd.f32 %v809_v18, %v774_v9  ;;  %v817_v32 = vadd.f32 %v816_v20, %v775_v61  ;;  %v824_v59 = vadd.f32 %v823_v21, %v776_v10 }
 0x1b1   :  { %v831_v62 = vadd.f32 %v830_v22, %v777_v12  ;;  %v838_v33 = vadd.f32 %v837_v23, %v778_v13  ;;  %v790_v63 = vrot.slane %v789_v30, 2  ;;  %v797_v0 = vrot.slane %v796_v26, 2 }
 0x1b2   :  { %v804_v41 = vrot.slane %v803_v31, 2  ;;  %v811_v1 = vrot.slane %v810_v36, 2  ;;  %v818_v47 = vrot.slane %v817_v32, 2  ;;  %v825_v37 = vrot.slane %v824_v59, 2 }
 0x1b3   :  { %v832_v42 = vrot.slane %v831_v62, 2  ;;  %v839_v39 = vrot.slane %v838_v33, 2  ;;  %v791_v51 = vadd.f32 %v790_v63, %v789_v30  ;;  %v798_v11 = vadd.f32 %v797_v0, %v796_v26 }
 0x1b4   :  { %v805_v17 = vadd.f32 %v804_v41, %v803_v31  ;;  %v812_v19 = vadd.f32 %v811_v1, %v810_v36  ;;  %v819_v49 = vadd.f32 %v818_v47, %v817_v32  ;;  %v826_v35 = vadd.f32 %v825_v37, %v824_v59 }
 0x1b5   :  { %v833_v40 = vadd.f32 %v832_v42, %v831_v62  ;;  %v840_v46 = vadd.f32 %v839_v39, %v838_v33  ;;  %v792_v50 = vrot.slane %v791_v51, 1  ;;  %v799_v24 = vrot.slane %v798_v11, 1 }
 0x1b6   :  { %v806_v27 = vrot.slane %v805_v17, 1  ;;  %v813_v57 = vrot.slane %v812_v19, 1  ;;  %v820_v25 = vrot.slane %v819_v49, 1  ;;  %v827_v44 = vrot.slane %v826_v35, 1 }
 0x1b7   :  { %v834_v28 = vrot.slane %v833_v40, 1  ;;  %v841_v2 = vrot.slane %v840_v46, 1  ;;  %v1310_v38 = vadd.f32 %v792_v50, %v791_v51  ;;  %v1312_v52 = vadd.f32 %v799_v24, %v798_v11 }
 0x1b8   :  { %v1314_v43 = vadd.f32 %v806_v27, %v805_v17  ;;  %v1316_v3 = vadd.f32 %v813_v57, %v812_v19  ;;  %v1318_v48 = vadd.f32 %v820_v25, %v819_v49  ;;  %v1320_v4 = vadd.f32 %v827_v44, %v826_v35 }
 0x1b9   :  { %v1322_v53 = vadd.f32 %v834_v28, %v833_v40  ;;  %v1324_v60 = vadd.f32 %v841_v2, %v840_v46  ;;  %v843_v54 = vmul.f32 %v771_v34, %v771_v34  ;;  %v844_v5 = vmul.f32 %v772_v8, %v772_v8 }
 0x1ba   :  { %v845_v55 = vmul.f32 %v773_v45, %v773_v45  ;;  %v846_v56 = vmul.f32 %v774_v9, %v774_v9  ;;  %v847_v58 = vmul.f32 %v775_v61, %v775_v61  ;;  %v848_v7 = vmul.f32 %v776_v10, %v776_v10 }
 0x1bb   :  { %v849_v29 = vmul.f32 %v777_v12, %v777_v12  ;;  %v850_v14 = vmul.f32 %v778_v13, %v778_v13  ;;  %v860_v15 = vrot.slane %v843_v54, 4  ;;  %v867_v16 = vrot.slane %v844_v5, 4 }
 0x1bc   :  { %v874_v18 = vrot.slane %v845_v55, 4  ;;  %v881_v20 = vrot.slane %v846_v56, 4  ;;  %v888_v21 = vrot.slane %v847_v58, 4  ;;  %v895_v22 = vrot.slane %v848_v7, 4 }
 0x1bd   :  { %v902_v23 = vrot.slane %v849_v29, 4  ;;  %v909_v30 = vrot.slane %v850_v14, 4  ;;  %v861_v26 = vadd.f32 %v860_v15, %v843_v54  ;;  %v868_v31 = vadd.f32 %v867_v16, %v844_v5 }
 0x1be   :  { %v875_v34 = vadd.f32 %v874_v18, %v845_v55  ;;  %v882_v8 = vadd.f32 %v881_v20, %v846_v56  ;;  %v889_v45 = vadd.f32 %v888_v21, %v847_v58  ;;  %v896_v9 = vadd.f32 %v895_v22, %v848_v7 }
 0x1bf   :  { %v903_v61 = vadd.f32 %v902_v23, %v849_v29  ;;  %v910_v10 = vadd.f32 %v909_v30, %v850_v14  ;;  %v862_v12 = vrot.slane %v861_v26, 2  ;;  %v869_v13 = vrot.slane %v868_v31, 2 }
 0x1c0   :  { %v876_v36 = vrot.slane %v875_v34, 2  ;;  %v883_v32 = vrot.slane %v882_v8, 2  ;;  %v890_v59 = vrot.slane %v889_v45, 2  ;;  %v897_v62 = vrot.slane %v896_v9, 2 }
 0x1c1   :  { %v904_v33 = vrot.slane %v903_v61, 2  ;;  %v911_v63 = vrot.slane %v910_v10, 2  ;;  %v863_v0 = vadd.f32 %v862_v12, %v861_v26  ;;  %v870_v41 = vadd.f32 %v869_v13, %v868_v31 }
 0x1c2   :  { %v877_v1 = vadd.f32 %v876_v36, %v875_v34  ;;  %v884_v47 = vadd.f32 %v883_v32, %v882_v8  ;;  %v891_v37 = vadd.f32 %v890_v59, %v889_v45  ;;  %v898_v42 = vadd.f32 %v897_v62, %v896_v9 }
 0x1c3   :  { %v905_v39 = vadd.f32 %v904_v33, %v903_v61  ;;  %v912_v51 = vadd.f32 %v911_v63, %v910_v10  ;;  %v864_v11 = vrot.slane %v863_v0, 1  ;;  %v871_v17 = vrot.slane %v870_v41, 1 }
 0x1c4   :  { %v878_v19 = vrot.slane %v877_v1, 1  ;;  %v885_v49 = vrot.slane %v884_v47, 1  ;;  %v892_v35 = vrot.slane %v891_v37, 1  ;;  %v899_v40 = vrot.slane %v898_v42, 1 }
 0x1c5   :  { %v906_v46 = vrot.slane %v905_v39, 1  ;;  %v913_v50 = vrot.slane %v912_v51, 1  ;;  %v865_v24 = vadd.f32 %v864_v11, %v863_v0  ;;  %v872_v27 = vadd.f32 %v871_v17, %v870_v41 }
 0x1c6   :  { %v879_v57 = vadd.f32 %v878_v19, %v877_v1  ;;  %v886_v25 = vadd.f32 %v885_v49, %v884_v47  ;;  %v893_v44 = vadd.f32 %v892_v35, %v891_v37  ;;  %v900_v28 = vadd.f32 %v899_v40, %v898_v42 }
 0x1c7   :  { %v907_v2 = vadd.f32 %v906_v46, %v905_v39  ;;  %v914_v54 = vadd.f32 %v913_v50, %v912_v51  ;;  %v917_v5 = vsel %vm916_vm3, %v865_v24, 0.0  ;;  %v918_v55 = vsel %vm916_vm3, %v872_v27, 0.0 }
 0x1c8   :  { %v919_v56 = vsel %vm916_vm3, %v879_v57, 0.0  ;;  %v920_v58 = vsel %vm916_vm3, %v886_v25, 0.0  ;;  %v921_v7 = vsel %vm916_vm3, %v893_v44, 0.0  ;;  %v922_v29 = vsel %vm916_vm3, %v900_v28, 0.0 }
 0x1c9   :  { %v923_v14 = vsel %vm916_vm3, %v907_v2, 0.0  ;;  %v924_v15 = vsel %vm916_vm3, %v914_v54, 0.0  ;;  %v925_v16 = vsel %vm915_vm4, %v1310_v38, %v917_v5  ;;  %v926_v18 = vsel %vm915_vm4, %v1312_v52, %v918_v55 }
 0x1ca   :  { %v927_v20 = vsel %vm915_vm4, %v1314_v43, %v919_v56  ;;  %v928_v21 = vsel %vm915_vm4, %v1316_v3, %v920_v58  ;;  %v929_v22 = vsel %vm915_vm4, %v1318_v48, %v921_v7  ;;  %v930_v38 = vsel %vm915_vm4, %v1320_v4, %v922_v29  ;;  %933 = vst [vmem:[%s1398_s6] sm:$0xff] %v925_v16 }
 0x1cb   :  { %v931_v52 = vsel %vm915_vm4, %v1322_v53, %v923_v14  ;;  %v932_v43 = vsel %vm915_vm4, %v1324_v60, %v924_v15  ;;  %934 = vst [vmem:[%s1398_s6 + $0x8] sm:$0xff] %v926_v18  ;;  %935 = vst [vmem:[%s1398_s6 + $0x10] sm:$0xff] %v927_v20 }
 0x1cc   :  { %936 = vst [vmem:[%s1398_s6 + $0x18] sm:$0xff] %v928_v21  ;;  %937 = vst [vmem:[%s1398_s6 + $0x20] sm:$0xff] %v929_v22 }
 0x1cd   :  { %938 = vst [vmem:[%s1398_s6 + $0x28] sm:$0xff] %v930_v38  ;;  %939 = vst [vmem:[%s1398_s6 + $0x30] sm:$0xff] %v931_v52 }
 0x1ce   :  { %940 = vst [vmem:[%s1398_s6 + $0x38] sm:$0xff] %v932_v43 }

// kernel: feature_extractor.3
= control target key start
LH: loop header
LB: loop body
LE: loop exit
PB: predicated region body
PF: predicated region fallthrough
CT: control target
= control target key end

     0   :  { %s1222_s1 = inlined_call_operand.vmem [shape: bf16[1024,128], index: 1, kind: input, shape index: {}]   ;;  %s1223_s0 = inlined_call_operand.vmem [shape: bf16[16,1024], index: 0, kind: input, shape index: {}]   ;;  %s1224_s2 = inlined_call_operand.vmem [shape: f32[1,128], index: 2, kind: input, shape index: {}]   ;;  %s1225_s3 = inlined_call_operand.vmem [shape: f32[16,128], index: 3, kind: output, shape index: {}]  }
   0x1   :  { %v913_v0 = vld [vmem:[%s1222_s1 + $0x40] sm:$0xff]   ;;  %v917_v4 = vld [vmem:[%s1222_s1 + $0x48] sm:$0xff]   ;;  %v921_v8 = vld [vmem:[%s1222_s1 + $0x50] sm:$0xff]  }
   0x2   :  { %v914_v1 = vld [vmem:[%s1222_s1 + $0xc0] sm:$0xff]   ;;  %825 = vmatprep.subr.bf16.mxu0 %v913_v0  ;;  %v918_v5 = vld [vmem:[%s1222_s1 + $0xc8] sm:$0xff]   ;;  %v922_v9 = vld [vmem:[%s1222_s1 + $0xd0] sm:$0xff]  }
   0x3   :  { %v915_v2 = vld [vmem:[%s1222_s1] sm:$0xff]   ;;  %847 = vmatprep.subr.bf16.mxu1 %v914_v1  ;;  %v919_v6 = vld [vmem:[%s1222_s1 + $0x8] sm:$0xff]   ;;  %v923_v10 = vld [vmem:[%s1222_s1 + $0x10] sm:$0xff]  }
   0x4   :  { %v916_v3 = vld [vmem:[%s1222_s1 + $0x80] sm:$0xff]   ;;  %826 = vmatpush3.bf16.msra.mxu0 %v915_v2  ;;  %v920_v7 = vld [vmem:[%s1222_s1 + $0x88] sm:$0xff]   ;;  %v924_v11 = vld [vmem:[%s1222_s1 + $0x90] sm:$0xff]  }
   0x5   :  { %848 = vmatpush3.bf16.msra.mxu1 %v916_v3  ;;  %827 = vmatprep.subr.bf16.mxu0 %v917_v4  ;;  %v925_v12 = vld [vmem:[%s1222_s1 + $0x58] sm:$0xff]   ;;  %v929_v16 = vld [vmem:[%s1222_s1 + $0x60] sm:$0xff]   ;;  %v933_v20 = vld [vmem:[%s1222_s1 + $0x68] sm:$0xff]  }
   0x6   :  { %849 = vmatprep.subr.bf16.mxu1 %v918_v5  ;;  %v926_v13 = vld [vmem:[%s1222_s1 + $0xd8] sm:$0xff]   ;;  %v930_v17 = vld [vmem:[%s1222_s1 + $0xe0] sm:$0xff]   ;;  %v934_v21 = vld [vmem:[%s1222_s1 + $0xe8] sm:$0xff]  }
   0x7   :  { %v927_v14 = vld [vmem:[%s1222_s1 + $0x18] sm:$0xff]   ;;  %v931_v18 = vld [vmem:[%s1222_s1 + $0x20] sm:$0xff]   ;;  %v935_v22 = vld [vmem:[%s1222_s1 + $0x28] sm:$0xff]  }
   0x8   :  { %828 = vmatpush3.bf16.msra.mxu0 %v919_v6  ;;  %v928_v15 = vld [vmem:[%s1222_s1 + $0x98] sm:$0xff]   ;;  %v932_v19 = vld [vmem:[%s1222_s1 + $0xa0] sm:$0xff]   ;;  %v936_v23 = vld [vmem:[%s1222_s1 + $0xa8] sm:$0xff]  }
   0x9   :  { %850 = vmatpush3.bf16.msra.mxu1 %v920_v7  ;;  %829 = vmatprep.subr.bf16.mxu0 %v921_v8  ;;  %v937_v24 = vld [vmem:[%s1222_s1 + $0x70] sm:$0xff]   ;;  %v941_v28 = vld [vmem:[%s1222_s1 + $0x78] sm:$0xff]   ;;  %v15_v32 = vld [vmem:[%s1223_s0] sm:$0xff] }
   0xa   :  { %851 = vmatprep.subr.bf16.mxu1 %v922_v9  ;;  %v938_v25 = vld [vmem:[%s1222_s1 + $0xf0] sm:$0xff]   ;;  %v942_v29 = vld [vmem:[%s1222_s1 + $0xf8] sm:$0xff]   ;;  %v19_v33 = vld [vmem:[%s1223_s0 + $0x20] sm:$0xff] }
   0xb   :  { %v939_v26 = vld [vmem:[%s1222_s1 + $0x30] sm:$0xff]   ;;  %v943_v30 = vld [vmem:[%s1222_s1 + $0x38] sm:$0xff]   ;;  %v16_v34 = vld [vmem:[%s1223_s0 + $0x8] sm:$0xff]  ;;  %v753_v35 = vcombine.low %v15_v32, %v19_v33  ;;  %v754_v36 = vcombine.high %v15_v32, %v19_v33 }
   0xc   :  { %830 = vmatpush3.bf16.msra.mxu0 %v923_v10  ;;  %v940_v27 = vld [vmem:[%s1222_s1 + $0xb0] sm:$0xff]   ;;  %v944_v31 = vld [vmem:[%s1222_s1 + $0xb8] sm:$0xff]   ;;  %v20_v37 = vld [vmem:[%s1223_s0 + $0x28] sm:$0xff] }
   0xd   :  { %852 = vmatpush3.bf16.msra.mxu1 %v924_v11  ;;  %831 = vmatprep.subr.bf16.mxu0 %v925_v12  ;;  %v755_v38 = vcombine.low %v16_v34, %v20_v37  ;;  %v756_v39 = vcombine.high %v16_v34, %v20_v37  ;;  %v945_v40 = vld [vmem:[%s1222_s1 + $0x140] sm:$0xff]   ;;  %v949_v44 = vld [vmem:[%s1222_s1 + $0x148] sm:$0xff]   ;;  %v953_v48 = vld [vmem:[%s1222_s1 + $0x150] sm:$0xff]  }
   0xe   :  { %853 = vmatprep.subr.bf16.mxu1 %v926_v13  ;;  %614 = vmatprep.mubr.bf16.mxu0 %v754_v36  ;;  %v946_v41 = vld [vmem:[%s1222_s1 + $0x1c0] sm:$0xff]   ;;  %v950_v45 = vld [vmem:[%s1222_s1 + $0x1c8] sm:$0xff]   ;;  %v954_v49 = vld [vmem:[%s1222_s1 + $0x1d0] sm:$0xff]  }
   0xf   :  { %655 = vmatprep.mubr.bf16.mxu1 %v756_v39  ;;  %v947_v42 = vld [vmem:[%s1222_s1 + $0x100] sm:$0xff]   ;;  %v951_v46 = vld [vmem:[%s1222_s1 + $0x108] sm:$0xff]   ;;  %v955_v50 = vld [vmem:[%s1222_s1 + $0x110] sm:$0xff]  }
  0x10   :  { %832 = vmatpush3.bf16.msra.mxu0 %v927_v14  ;;  %v948_v43 = vld [vmem:[%s1222_s1 + $0x180] sm:$0xff]   ;;  %v952_v47 = vld [vmem:[%s1222_s1 + $0x188] sm:$0xff]   ;;  %v956_v51 = vld [vmem:[%s1222_s1 + $0x190] sm:$0xff]  }
  0x11   :  { %854 = vmatpush3.bf16.msra.mxu1 %v928_v15  ;;  %833 = vmatprep.subr.bf16.mxu0 %v929_v16  ;;  %v957_v52 = vld [vmem:[%s1222_s1 + $0x158] sm:$0xff]   ;;  %v961_v56 = vld [vmem:[%s1222_s1 + $0x160] sm:$0xff]   ;;  %v965_v60 = vld [vmem:[%s1222_s1 + $0x168] sm:$0xff]  }
  0x12   :  { %855 = vmatprep.subr.bf16.mxu1 %v930_v17  ;;  %v958_v53 = vld [vmem:[%s1222_s1 + $0x1d8] sm:$0xff]   ;;  %v962_v57 = vld [vmem:[%s1222_s1 + $0x1e0] sm:$0xff]   ;;  %v966_v61 = vld [vmem:[%s1222_s1 + $0x1e8] sm:$0xff]  }
  0x13   :  { %v959_v54 = vld [vmem:[%s1222_s1 + $0x118] sm:$0xff]   ;;  %v963_v58 = vld [vmem:[%s1222_s1 + $0x120] sm:$0xff]   ;;  %v967_v62 = vld [vmem:[%s1222_s1 + $0x128] sm:$0xff]  }
  0x14   :  { %834 = vmatpush3.bf16.msra.mxu0 %v931_v18  ;;  %v960_v55 = vld [vmem:[%s1222_s1 + $0x198] sm:$0xff]   ;;  %v964_v59 = vld [vmem:[%s1222_s1 + $0x1a0] sm:$0xff]   ;;  %v968_v63 = vld [vmem:[%s1222_s1 + $0x1a8] sm:$0xff]  }
  0x15   :  { %856 = vmatpush3.bf16.msra.mxu1 %v932_v19  ;;  %835 = vmatprep.subr.bf16.mxu0 %v933_v20  ;;  %v969_v0 = vld [vmem:[%s1222_s1 + $0x170] sm:$0xff]   ;;  %v973_v4 = vld [vmem:[%s1222_s1 + $0x178] sm:$0xff]   ;;  %v752_v18 = vld [vmem:[%s1224_s2] ss:$0 sm:$0xff] }
  0x16   :  { %857 = vmatprep.subr.bf16.mxu1 %v934_v21  ;;  %v970_v1 = vld [vmem:[%s1222_s1 + $0x1f0] sm:$0xff]   ;;  %v974_v5 = vld [vmem:[%s1222_s1 + $0x1f8] sm:$0xff]  }
  0x17   :  { %v971_v2 = vld [vmem:[%s1222_s1 + $0x130] sm:$0xff]   ;;  %v975_v6 = vld [vmem:[%s1222_s1 + $0x138] sm:$0xff]  }
  0x18   :  { %836 = vmatpush3.bf16.msra.mxu0 %v935_v22  ;;  %v972_v3 = vld [vmem:[%s1222_s1 + $0x1b0] sm:$0xff]   ;;  %v976_v7 = vld [vmem:[%s1222_s1 + $0x1b8] sm:$0xff]  }
  0x19   :  { %858 = vmatpush3.bf16.msra.mxu1 %v936_v23  ;;  %837 = vmatprep.subr.bf16.mxu0 %v937_v24  ;;  %v17_v8 = vld [vmem:[%s1223_s0 + $0x10] sm:$0xff]  ;;  %v18_v12 = vld [vmem:[%s1223_s0 + $0x18] sm:$0xff] }
  0x1a   :  { %859 = vmatprep.subr.bf16.mxu1 %v938_v25  ;;  %v21_v9 = vld [vmem:[%s1223_s0 + $0x30] sm:$0xff]  ;;  %v22_v13 = vld [vmem:[%s1223_s0 + $0x38] sm:$0xff] }
  0x1b   :  { %v757_v10 = vcombine.low %v17_v8, %v21_v9  ;;  %v758_v11 = vcombine.high %v17_v8, %v21_v9  ;;  %v759_v14 = vcombine.low %v18_v12, %v22_v13  ;;  %v760_v15 = vcombine.high %v18_v12, %v22_v13 }
  0x1c   :  { %838 = vmatpush3.bf16.msra.mxu0 %v939_v26 }
  0x1d   :  { %860 = vmatpush3.bf16.msra.mxu1 %v940_v27  ;;  %839 = vmatprep.subr.bf16.mxu0 %v941_v28 }
  0x1e   :  { %861 = vmatprep.subr.bf16.mxu1 %v942_v29 }
  0x20   :  { %840 = vmatpush3.bf16.msra.mxu0 %v943_v30 }
  0x21   :  { %862 = vmatpush3.bf16.msra.mxu1 %v944_v31  ;;  %869 = vmatprep.subr.bf16.mxu0 %v945_v40 }
  0x22   :  { %891 = vmatprep.subr.bf16.mxu1 %v946_v41 }
  0x23   :  { %615 = vmatmul.mubr.bf16.vlgmr.msra.gmra.mrb[0].mxu0 %v753_v35 }
  0x24   :  { %656 = vmatmul.mubr.bf16.vlgmr.msra.gmra.mrb[0].mxu1 %v755_v38  ;;  %870 = vmatpush3.bf16.msra.mxu0 %v947_v42 }
  0x25   :  { %892 = vmatpush3.bf16.msra.mxu1 %v948_v43  ;;  %871 = vmatprep.subr.bf16.mxu0 %v949_v44 }
  0x26   :  { %893 = vmatprep.subr.bf16.mxu1 %v950_v45  ;;  %696 = vmatprep.mubr.bf16.mxu0 %v758_v11 }
  0x27   :  { %737 = vmatprep.mubr.bf16.mxu1 %v760_v15 }
  0x28   :  { %872 = vmatpush3.bf16.msra.mxu0 %v951_v46 }
  0x29   :  { %894 = vmatpush3.bf16.msra.mxu1 %v952_v47  ;;  %873 = vmatprep.subr.bf16.mxu0 %v953_v48 }
  0x2a   :  { %895 = vmatprep.subr.bf16.mxu1 %v954_v49 }
  0x2c   :  { %874 = vmatpush3.bf16.msra.mxu0 %v955_v50 }
  0x2d   :  { %896 = vmatpush3.bf16.msra.mxu1 %v956_v51  ;;  %875 = vmatprep.subr.bf16.mxu0 %v957_v52 }
  0x2e   :  { %897 = vmatprep.subr.bf16.mxu1 %v958_v53 }
  0x30   :  { %876 = vmatpush3.bf16.msra.mxu0 %v959_v54 }
  0x31   :  { %898 = vmatpush3.bf16.msra.mxu1 %v960_v55  ;;  %877 = vmatprep.subr.bf16.mxu0 %v961_v56 }
  0x32   :  { %899 = vmatprep.subr.bf16.mxu1 %v962_v57 }
  0x34   :  { %878 = vmatpush3.bf16.msra.mxu0 %v963_v58 }
  0x35   :  { %900 = vmatpush3.bf16.msra.mxu1 %v964_v59  ;;  %879 = vmatprep.subr.bf16.mxu0 %v965_v60 }
  0x36   :  { %901 = vmatprep.subr.bf16.mxu1 %v966_v61 }
  0x38   :  { %880 = vmatpush3.bf16.msra.mxu0 %v967_v62 }
  0x39   :  { %902 = vmatpush3.bf16.msra.mxu1 %v968_v63  ;;  %881 = vmatprep.subr.bf16.mxu0 %v969_v0 }
  0x3a   :  { %903 = vmatprep.subr.bf16.mxu1 %v970_v1 }
  0x3c   :  { %882 = vmatpush3.bf16.msra.mxu0 %v971_v2 }
  0x3d   :  { %904 = vmatpush3.bf16.msra.mxu1 %v972_v3  ;;  %883 = vmatprep.subr.bf16.mxu0 %v973_v4 }
  0x3e   :  { %905 = vmatprep.subr.bf16.mxu1 %v974_v5 }
  0x40   :  { %884 = vmatpush3.bf16.msra.mxu0 %v975_v6 }
  0x41   :  { %906 = vmatpush3.bf16.msra.mxu1 %v976_v7 }
  0x43   :  { %697 = vmatmul.mubr.bf16.vlgmr.msra.gmra.mrb[4].mxu0 %v757_v10 }
  0x44   :  { %738 = vmatmul.mubr.bf16.vlgmr.msra.gmra.mrb[4].mxu1 %v759_v14 }
  0xf6   :  { %v841_v16 = vpop.f32.mrb[0].mxu0 }
  0xf7   :  { %v863_v17 = vpop.f32.mrb[0].mxu1  ;;  %v842_v19 = vpop.f32.mrb[1].mxu0 }
  0xf8   :  { %v843_v20 = vadd.f32 %v842_v19, %v841_v16  ;;  %v864_v21 = vpop.f32.mrb[1].mxu1  ;;  %v844_v22 = vpop.f32.mrb[2].mxu0 }
  0xf9   :  { %v865_v23 = vadd.f32 %v864_v21, %v863_v17  ;;  %v866_v24 = vpop.f32.mrb[2].mxu1  ;;  %v845_v25 = vpop.f32.mrb[3].mxu0 }
  0xfa   :  { %v617_v26 = vadd.f32 %v843_v20, %v752_v18  ;;  %v846_v27 = vadd.f32 %v845_v25, %v844_v22  ;;  %v867_v28 = vpop.f32.mrb[3].mxu1 }
  0xfb   :  { %v868_v29 = vadd.f32 %v867_v28, %v866_v24 }
  0xfc   :  { %v658_v30 = vadd.f32 %v865_v23, %v617_v26  ;;  %v620_v31 = vadd.f32 %v846_v27, %v752_v18 }
  0xfe   :  { %v661_v32 = vadd.f32 %v868_v29, %v620_v31 }
 0x116   :  { %v885_v33 = vpop.f32.mrb[4].mxu0 }
 0x117   :  { %v907_v34 = vpop.f32.mrb[4].mxu1  ;;  %v886_v35 = vpop.f32.mrb[5].mxu0 }
 0x118   :  { %v887_v36 = vadd.f32 %v886_v35, %v885_v33  ;;  %v908_v37 = vpop.f32.mrb[5].mxu1  ;;  %v888_v38 = vpop.f32.mrb[6].mxu0 }
 0x119   :  { %v909_v39 = vadd.f32 %v908_v37, %v907_v34  ;;  %v910_v40 = vpop.f32.mrb[6].mxu1  ;;  %v889_v41 = vpop.f32.mrb[7].mxu0 }
 0x11a   :  { %v699_v42 = vadd.f32 %v887_v36, %v658_v30  ;;  %v890_v43 = vadd.f32 %v889_v41, %v888_v38  ;;  %v911_v44 = vpop.f32.mrb[7].mxu1 }
 0x11b   :  { %v912_v45 = vadd.f32 %v911_v44, %v910_v40 }
 0x11c   :  { %v740_v46 = vadd.f32 %v909_v39, %v699_v42  ;;  %v702_v47 = vadd.f32 %v890_v43, %v661_v32 }
 0x11e   :  { %746 = vst [vmem:[%s1225_s3] sm:$0xff] %v740_v46  ;;  %v743_v48 = vadd.f32 %v912_v45, %v702_v47 }
 0x120   :  { %747 = vst [vmem:[%s1225_s3 + $0x8] sm:$0xff] %v743_v48 }

</bundles_post_ra>
